<compile_context>
chip_gen: v5e
topology: v5e:2x2
jax: 0.10.0
libtpu: 0.0.40
codegen_flags: <defaults>
</compile_context>

<pallas_src>
import functools

import jax
import jax.numpy as jnp
from jax import lax
from jax.experimental import pallas as pl
from jax.experimental.pallas import tpu as pltpu


def _round_up(x, m):
    return ((x + m - 1) // m) * m


def _embed_onehot_kernel(ids_ref, w_ref, o_ref, *, vocab):
    """One grid step: embed a block of T tokens via a one-hot MXU matmul.

    ids_ref : (T, 1) int32   token ids for this block (VMEM)
    w_ref   : (V, D)         full embedding table, single resident VMEM copy
    o_ref   : (T, D)         output block
    """
    ids = ids_ref[...]                                              # (T, 1)
    t = ids.shape[0]
    onehot = (lax.broadcasted_iota(jnp.int32, (t, vocab), 1) == ids)
    onehot = onehot.astype(w_ref.dtype)                             # (T, V)
    # Row gather as (T, V) @ (V, D) on the MXU. HIGHEST precision keeps the
    # f32 gather exact (multi-pass f32 matmul) instead of bf16-truncated.
    o_ref[...] = jnp.dot(
        onehot, w_ref[...],
        preferred_element_type=jnp.float32,
        precision=jax.lax.Precision.HIGHEST,
    ).astype(o_ref.dtype)


def word_embedding_forward(indices, weight, *, max_block_tokens=1024):
    """Embedding lookup: out[..., :] = weight[indices[...], :] (nn.Embedding)."""
    orig_shape = indices.shape
    V, D = weight.shape
    itemsize = jnp.dtype(weight.dtype).itemsize

    # NOTE: nn.Embedding errors on out-of-range ids; here they are clamped once
    # on the host side (also makes the padded tail tokens below point at row 0).
    flat_ids = jnp.clip(indices.reshape(-1).astype(jnp.int32), 0, V - 1)
    N = flat_ids.shape[0]

    # Tokens per grid step: multiple of 8 (sublane-dense output), sized so the
    # (T, D) output block and the in-kernel (T, V) one-hot are each ~<=2 MiB.
    t_out = max(8, (2 << 20) // max(D * itemsize, 1))
    t_onehot = max(8, (2 << 20) // max(V * 4, 1))
    T = min(max_block_tokens, t_out, t_onehot)
    T = max(8, (T // 8) * 8)
    T = min(T, _round_up(N, 8))

    N_pad = _round_up(N, T)
    if N_pad != N:
        flat_ids = jnp.pad(flat_ids, (0, N_pad - N))  # pad -> row 0, sliced off
    num_blocks = N_pad // T
    ids_2d = flat_ids.reshape(N_pad, 1)

    # VMEM budget: 1x resident table (whole-array VMEM operand, no double
    # buffering) + double-buffered ids / output blocks + slack.
    table_bytes = V * D * itemsize
    block_bytes = T * D * itemsize + T * 4
    vmem_needed = table_bytes + 2 * block_bytes + (2 << 20)
    try:
        vmem_cap = int(pltpu.get_tpu_info().vmem_capacity_bytes)
    except Exception:
        vmem_cap = 64 << 20  # conservative fallback: v7x per-TensorCore VMEM
    vmem_limit = int(min(max(vmem_needed, 16 << 20), int(0.85 * vmem_cap)))
    # TODO(synk): vocab tables too large to stay VMEM-resident (> ~48 MiB on
    # v7x) need an HBM path: weight in memory_space=pl.ANY with 8-16
    # outstanding pltpu.make_async_copy row-group DMAs. Not needed at this
    # module's sizes.

    kernel = functools.partial(_embed_onehot_kernel, vocab=V)
    out_flat = pl.pallas_call(
        kernel,
        out_shape=jax.ShapeDtypeStruct((N_pad, D), weight.dtype),
        grid=(num_blocks,),
        in_specs=[
            # Per-block token ids (replaces scalar-prefetching ALL ids into
            # tiny SMEM; scales to arbitrary batch*seq lengths).
            pl.BlockSpec((T, 1), lambda i: (i, 0)),
            # Whole embedding table as an un-pipelined VMEM operand: DMA'd from
            # HBM once, held as a single buffer for every grid step.
            pl.BlockSpec(memory_space=pltpu.MemorySpace.VMEM),
        ],
        out_specs=pl.BlockSpec((T, D), lambda i: (i, 0)),
        compiler_params=pltpu.CompilerParams(
            # TODO(synk): on v7x, pltpu.CORE_PARALLEL (or pl.core_map over a TC
            # mesh) would split token blocks across both TensorCores; plain
            # "parallel" is kept here for portability across v5e/v6e/v7x.
            dimension_semantics=("parallel",),
            vmem_limit_bytes=vmem_limit),
    )(ids_2d, weight)

    return out_flat[:N].reshape(*orig_shape, D)


if __name__ == "__main__":
    # Deterministic synthetic parameters (mirrors np.random.uniform(-1, 1, (V, D))
    # copied into nn.Embedding.weight, which is float32).
    vocab_length = 32
    embedding_dim = 128
    B, S = 2, 8

    key = jax.random.PRNGKey(0)
    k_w, k_idx = jax.random.split(key)
    weight = jax.random.uniform(
        k_w, (vocab_length, embedding_dim), dtype=jnp.float32,
        minval=-1.0, maxval=1.0)
    input_sentence = jax.random.randint(
        k_idx, (B, S), minval=0, maxval=vocab_length, dtype=jnp.int32)

    sen_embed = word_embedding_forward(input_sentence, weight)
    sen_embed = jax.block_until_ready(sen_embed)

    # Correctness check against plain-JAX reference gather.
    ref = weight[input_sentence]
    assert sen_embed.shape == (B, S, embedding_dim)
    assert sen_embed.dtype == jnp.float32
    assert jnp.allclose(sen_embed, ref, rtol=1e-6, atol=1e-6)

    print("KERNEL_OK")
</pallas_src>

<mosaic_0001>
module attributes {stable_mosaic.version = 11 : i64} {
  func.func @_embed_onehot_kernel(%arg0: i32, %arg1: memref<16x1xi32, #tpu.memory_space<vmem>>, %arg2: memref<32x128xf32, #tpu.memory_space<vmem>>, %arg3: memref<16x128xf32, #tpu.memory_space<vmem>>) attributes {dimension_semantics = [#tpu.dimension_semantics<parallel>], iteration_bounds = array<i64: 1>, scalar_prefetch = 0 : i64, scratch_operands = 0 : i64, tpu.core_type = #tpu.core_type<tc>, window_params = [{transform_indices = @transform_0, window_bounds = array<i64: 16, 1>}, {pipeline_mode = #tpu.pipeline_mode<synchronous>, transform_indices = @transform_1, window_bounds = array<i64: 32, 128>}, {transform_indices = @transform_2, window_bounds = array<i64: 16, 128>}]} {
    %c0 = arith.constant 0 : index
    %c0_0 = arith.constant 0 : index
    %0 = vector.load %arg1[%c0, %c0_0] : memref<16x1xi32, #tpu.memory_space<vmem>>, vector<16x1xi32>
    %1 = tpu.iota {dimensions = array<i32: 1>} : vector<16x32xi32>
    %2 = vector.broadcast %0 : vector<16x1xi32> to vector<16x32xi32>
    %3 = arith.cmpi eq, %1, %2 : vector<16x32xi32>
    %4 = arith.extui %3 : vector<16x32xi1> to vector<16x32xi32>
    %5 = arith.sitofp %4 : vector<16x32xi32> to vector<16x32xf32>
    %c0_1 = arith.constant 0 : index
    %c0_2 = arith.constant 0 : index
    %6 = vector.load %arg2[%c0_1, %c0_2] : memref<32x128xf32, #tpu.memory_space<vmem>>, vector<32x128xf32>
    %cst = arith.constant dense<0.000000e+00> : vector<16x128xf32>
    %7 = tpu.matmul %5, %6, %cst {dimension_numbers = #tpu.dot_dimension_numbers<[1], [0], [0], [1], [0, 0, 1, 1], [], []>, precision = #tpu.contract_precision<fp32>} : vector<16x32xf32>, vector<32x128xf32>, vector<16x128xf32> -> vector<16x128xf32>
    %c0_3 = arith.constant 0 : index
    %c0_4 = arith.constant 0 : index
    %8 = vector.load %arg3[%c0_3, %c0_4] : memref<16x128xf32, #tpu.memory_space<vmem>>, vector<16x128xf32>
    tpu.vector_store %arg3[%c0_3, %c0_4], %7 {strides = array<i32>} : memref<16x128xf32, #tpu.memory_space<vmem>>, vector<16x128xf32>,
    return
  }
  func.func @transform_0(%arg0: i32) -> (i32, i32) {
    %c0_i32 = arith.constant 0 : i32
    %c0_i32_0 = arith.constant 0 : i32
    return %arg0, %c0_i32 : i32, i32
  }
  func.func @transform_1(%arg0: i32) -> (i32, i32) {
    %c0_i32 = arith.constant 0 : i32
    %c0_i32_0 = arith.constant 0 : i32
    %c0_i32_1 = arith.constant 0 : i32
    return %c0_i32, %c0_i32_0 : i32, i32
  }
  func.func @transform_2(%arg0: i32) -> (i32, i32) {
    %c0_i32 = arith.constant 0 : i32
    %c0_i32_0 = arith.constant 0 : i32
    return %arg0, %c0_i32 : i32, i32
  }
}

</mosaic_0001>

<bundles_post_ra>
// kernel: tpu_custom_call.1
= control target key start
LH: loop header
LB: loop body
LE: loop exit
PB: predicated region body
PF: predicated region fallthrough
CT: control target
= control target key end

     0   :  { %7 = vsyncpa [#allocation3], 0  ;;  %s414_s0 = inlined_call_operand.vmem [shape: s32[16,1], index: 0, kind: input, shape index: {}]   ;;  %s415_s1 = inlined_call_operand.hbm [shape: f32[32,128], index: 1, kind: input, shape index: {}]   ;;  %s416_s2 = inlined_call_operand.hbm [shape: f32[16,128], index: 2, kind: output, shape index: {}]  }
   0x1   :  { %8 = vsyncpa [#allocation4], 0  ;;  %s15_s11 = sshll.u32 %s415_s1, 4  ;;  %s367_s12 = smov [#allocation2]   ;;  %s16_s11 = int_to_ptr.hbm [resolvable:$true] %s15_s11 }
   0x2   :  { %s17_s13 = sshll.u32 %s367_s12, 4  ;;  %s368_s14 = smov 128   ;;  %s18_s13 = int_to_ptr.vmem [resolvable:$true] %s17_s13 }
   0x3   :  { %s369_s15 = smov 8  }
   0x4   :  { %23 = dma.hbm_to_vmem [thread:$0]  %s16_s11, 512, %s18_s13, [#allocation3], %s368_s14, %s368_s14, %s369_s15  }
   0x5   :  { %363 = dma.done.wait [#allocation3], 512  }
   0x6   :  { %364 = vsyncadd [#allocation3], 4294966784  ;;  %v370_v0 = vmov 0   ;;  %v29_v1 = vld [vmem:[%s414_s0 + $0x8] sm:$0xff]  ;;  %v47_v2 = vld [vmem:[#allocation2 + $0x18] sm:$0xff]  ;;  %v30_v27 = vlaneseq  ;;  %vm48_vm0 = vcmask 261120  }
   0x7   :  { %314 = vset.pattern.permute.xlu0 %v370_v0  ;;  %v67_v3 = vand.u32 4294901760, %v47_v2  ;;  %v46_v4 = vld [vmem:[#allocation2 + $0x10] sm:$0xff]  ;;  %v45_v5 = vld [vmem:[#allocation2 + $0x8] sm:$0xff]  ;;  %v28_v12 = vld [vmem:[%s414_s0] sm:$0xff]  ;;  %v371_v30 = vmov 0.0   ;;  %s372_s0 = smov [#allocation5]  }
   0x8   :  { %36 = vperm.xlu0 %314, %v29_v1   ;;  %v69_v6 = vand.u32 4294901760, %v46_v4  ;;  %v71_v7 = vand.u32 4294901760, %v45_v5  ;;  %v44_v21 = vld [vmem:[#allocation2] sm:$0xff]  ;;  %v31_v28 = vand.u32 127, %v30_v27  ;;  %s277_s19 = sshll.u32 %s372_s0, 4  ;;  %s279_s22 = sshll.u32 %s416_s2, 4  ;;  %s278_s19 = int_to_ptr.vmem [resolvable:$true] %s277_s19  ;;  %s280_s22 = int_to_ptr.hbm [resolvable:$true] %s279_s22 }
   0x9   :  { %v105_v8 = vsub.f32 %v47_v2, %v67_v3  ;;  %300 = vmatpush.msra.mxu2 %v67_v3  ;;  %68 = vmatpush.msra.mxu0 %v67_v3  ;;  %v73_v22 = vand.u32 4294901760, %v44_v21 }
   0xa   :  { %v111_v9 = vsub.f32 %v46_v4, %v69_v6  ;;  %v117_v10 = vsub.f32 %v45_v5, %v71_v7 }
   0xb   :  { %v106_v11 = vand.u32 4294901760, %v105_v8  ;;  %301 = vmatpush.msra.mxu2 %v69_v6  ;;  %70 = vmatpush.msra.mxu0 %v69_v6  ;;  %v123_v23 = vsub.f32 %v44_v21, %v73_v22 }
   0xc   :  { %v112_v13 = vand.u32 4294901760, %v111_v9  ;;  %v118_v14 = vand.u32 4294901760, %v117_v10 }
   0xd   :  { %v107_v15 = vsub.f32 %v105_v8, %v106_v11  ;;  %302 = vmatpush.msra.mxu2 %v71_v7  ;;  %72 = vmatpush.msra.mxu0 %v71_v7  ;;  %v124_v24 = vand.u32 4294901760, %v123_v23 }
   0xe   :  { %v113_v16 = vsub.f32 %v111_v9, %v112_v13  ;;  %v119_v17 = vsub.f32 %v117_v10, %v118_v14 }
   0xf   :  { %v108_v18 = vand.u32 4294901760, %v107_v15  ;;  %303 = vmatpush.msra.mxu2 %v73_v22  ;;  %74 = vmatpush.msra.mxu0 %v73_v22  ;;  %v125_v25 = vsub.f32 %v123_v23, %v124_v24 }
  0x10   :  { %33 = vperm.xlu0 %314, %v28_v12   ;;  %v114_v19 = vand.u32 4294901760, %v113_v16  ;;  %v120_v20 = vand.u32 4294901760, %v119_v17 }
  0x11   :  { %304 = vmatpush.msra.mxu3 %v108_v18  ;;  %109 = vmatpush.msra.mxu1 %v108_v18  ;;  %v126_v26 = vand.u32 4294901760, %v125_v25 }
  0x12   :  { %151 = vmatpush.msrb.mxu2 %v105_v8  ;;  %220 = vmatpush.msrb.mxu0 %v106_v11 }
  0x13   :  { %305 = vmatpush.msra.mxu3 %v114_v19  ;;  %115 = vmatpush.msra.mxu1 %v114_v19 }
  0x14   :  { %154 = vmatpush.msrb.mxu2 %v111_v9  ;;  %224 = vmatpush.msrb.mxu0 %v112_v13 }
  0x15   :  { %306 = vmatpush.msra.mxu3 %v120_v20  ;;  %121 = vmatpush.msra.mxu1 %v120_v20 }
  0x16   :  { %157 = vmatpush.msrb.mxu2 %v117_v10  ;;  %228 = vmatpush.msrb.mxu0 %v118_v14 }
  0x17   :  { %307 = vmatpush.msra.mxu3 %v126_v26  ;;  %127 = vmatpush.msra.mxu1 %v126_v26 }
  0x18   :  { %160 = vmatpush.msrb.mxu2 %v123_v23  ;;  %232 = vmatpush.msrb.mxu0 %v124_v24 }
  0x19   :  { %185 = vmatpush.msrb.mxu3 %v67_v3  ;;  %255 = vmatpush.msrb.mxu1 %v67_v3 }
  0x1b   :  { %187 = vmatpush.msrb.mxu3 %v69_v6  ;;  %257 = vmatpush.msrb.mxu1 %v69_v6 }
  0x1d   :  { %189 = vmatpush.msrb.mxu3 %v71_v7  ;;  %259 = vmatpush.msrb.mxu1 %v71_v7 }
  0x1f   :  { %191 = vmatpush.msrb.mxu3 %v73_v22  ;;  %261 = vmatpush.msrb.mxu1 %v73_v22 }
  0x7a   :  { %v37_v29 = vpop.permute.xlu0 %36 }
  0x7b   :  { %vm39_vm1 = vcmp.eq.s32.totalorder %v31_v28, %v37_v29 }
  0x7c   :  { %v293_v31 = vsel %vm39_vm1, 1.0, %v371_v30 }
  0x7d   :  { %v53_v32 = vsel %vm48_vm0, %v293_v31, 0  ;;  %295 = vmatmul.msk.f32.vlgmr.msra.gmra.mxu3 %vm48_vm0, %v293_v31 }
  0x7e   :  { %v84_v33 = vsub.f32 %v53_v32, %v53_v32 }
  0x80   :  { %v85_v34 = vand.u32 4294901760, %v84_v33 }
  0x82   :  { %v34_v35 = vpop.permute.xlu0 %33  ;;  %v86_v36 = vsub.f32 %v84_v33, %v85_v34 }
  0x83   :  { %vm38_vm2 = vcmp.eq.s32.totalorder %v31_v28, %v34_v35 }
  0x84   :  { %v292_v37 = vsel %vm38_vm2, 1.0, %v371_v30  ;;  %v87_v38 = vand.u32 4294901760, %v86_v36 }
  0x85   :  { %v50_v39 = vsel %vm48_vm0, %v292_v37, 0  ;;  %294 = vmatmul.msk.f32.vlgmr.msra.gmra.mxu1 %vm48_vm0, %v292_v37 }
  0x86   :  { %v76_v40 = vsub.f32 %v50_v39, %v50_v39  ;;  %88 = vmatmul.f32.vlgmr.msra.gmra.mxu2 %v87_v38 }
  0x88   :  { %v77_v41 = vand.u32 4294901760, %v76_v40 }
  0x8a   :  { %195 = vmatmul.f32.vlgmr.msrb.gmra.mxu3 %v77_v41  ;;  %v78_v42 = vsub.f32 %v76_v40, %v77_v41 }
  0x8c   :  { %v79_v43 = vand.u32 4294901760, %v78_v42 }
  0x8d   :  { %298 = vmatmul.msk.f32.vlgmr.msrb.gmra.mxu1 %vm48_vm0, %v292_v37 }
  0x8e   :  { %80 = vmatmul.f32.vlgmr.msra.gmra.mxu0 %v79_v43  ;;  %163 = vmatmul.f32.vlgmr.msrb.gmra.mxu2 %v76_v40 }
  0x92   :  { %201 = vmatmul.f32.gmra.mxu3 %v85_v34 }
  0x95   :  { %299 = vmatmul.msk.f32.gmra.mxu1 %vm48_vm0, %v293_v31 }
  0x96   :  { %168 = vmatmul.f32.gmra.mxu2 %v84_v33  ;;  %296 = vmatmul.msk.f32.vlgmr.msrb.gmra.mxu0 %vm48_vm0, %v292_v37 }
  0x9e   :  { %297 = vmatmul.msk.f32.gmra.mxu0 %vm48_vm0, %v293_v31 }
 0x100   :  { %v134_v44 = vpop.f32.mrf.mxu3 }
 0x102   :  { %v130_v46 = vpop.f32.mrf.mxu1 }
 0x109   :  { %v89_v45 = vpop.f32.mrf.mxu2 }
 0x10a   :  { %v264_v54 = vpop.f32.mrf.mxu1  ;;  %v135_v56 = vadd.f32 %v134_v44, %v89_v45 }
 0x10b   :  { %v81_v47 = vpop.f32.mrf.mxu0 }
 0x10c   :  { %v131_v48 = vadd.f32 %v130_v46, %v81_v47 }
 0x10d   :  { %v196_v49 = vpop.f32.mrf.mxu3 }
 0x111   :  { %v164_v50 = vpop.f32.mrf.mxu2 }
 0x112   :  { %v165_v51 = vadd.f32 %v164_v50, %v131_v48  ;;  %v268_v0 = vpop.f32.mrf.mxu1 }
 0x113   :  { %v235_v52 = vpop.f32.mrf.mxu0 }
 0x114   :  { %v197_v53 = vadd.f32 %v196_v49, %v165_v51 }
 0x115   :  { %v202_v60 = vpop.f32.mrf.mxu3 }
 0x116   :  { %v236_v55 = vadd.f32 %v235_v52, %v197_v53 }
 0x118   :  { %v265_v57 = vadd.f32 %v264_v54, %v236_v55 }
 0x119   :  { %v169_v58 = vpop.f32.mrf.mxu2 }
 0x11a   :  { %271 = vst [vmem:[#allocation5] sm:$0xff] %v265_v57  ;;  %v170_v59 = vadd.f32 %v169_v58, %v135_v56 }
 0x11b   :  { %v239_v62 = vpop.f32.mrf.mxu0 }
 0x11c   :  { %v203_v61 = vadd.f32 %v202_v60, %v170_v59 }
 0x11e   :  { %v240_v63 = vadd.f32 %v239_v62, %v203_v61 }
 0x120   :  { %v269_v1 = vadd.f32 %v268_v0, %v240_v63 }
 0x122   :  { %272 = vst [vmem:[#allocation5 + $0x8] sm:$0xff] %v269_v1 }
 0x123   :  { %285 = dma.vmem_to_hbm [thread:$0]  %s278_s19, 256, %s280_s22, [#allocation4], %s368_s14, %s368_s14, %s369_s15  }
 0x124   :  { %365 = dma.done.wait [#allocation4], 256  }
 0x125   :  { %366 = vsyncadd [#allocation4], 4294967040 }
 0x126   :  { %290 = vsyncpa [#allocation3], 1 }
 0x127   :  { %291 = vsyncpa [#allocation4], 1 }

</bundles_post_ra>
